<compile_context>
chip_gen: v6e
topology: v6e:2x2x1
jax: 0.10.0
libtpu: 0.0.40
codegen_flags: <defaults>
</compile_context>

<pallas_src>
import math

import jax
import jax.numpy as jnp
from jax.experimental import pallas as pl
from jax.experimental.pallas import tpu as pltpu


# ----------------------------------------------------------------------------- kernel
def actor_kernel(x_ref, w1_ref, w2_ref, w34_ref, b_ref, o_ref):
    """One batch tile: (TB, S) -> (TB, action_dim).

    Weights arrive BN-folded; layers 3+4 are pre-folded into w34.  The matmuls run
    in the weights' dtype (f32 or bf16) with f32 accumulation; the epilogue
    (bias add, ReLU, tanh) is f32.
    """
    cdt = w1_ref.dtype                       # compute dtype for the MXU dots
    adim = w34_ref.shape[1]                  # action_dim

    # Layer 1: Linear (+ folded BN) -> ReLU      (Dropout == identity in eval)
    h = jnp.dot(x_ref[...].astype(cdt), w1_ref[...],
                preferred_element_type=jnp.float32)
    h = jnp.maximum(h + b_ref[0:1, :], 0.0)

    # Layer 2: Linear (+ folded BN) -> ReLU
    h = jnp.dot(h.astype(cdt), w2_ref[...], preferred_element_type=jnp.float32)
    h = jnp.maximum(h + b_ref[1:2, :], 0.0)

    # Layers 3+4 folded: Linear(128,64)+BN followed by (Noisy)Linear(64,A) -> Tanh
    a = jnp.dot(h.astype(cdt), w34_ref[...], preferred_element_type=jnp.float32)
    o_ref[...] = jnp.tanh(a + b_ref[2:3, :adim])


# ----------------------------------------------------------------------------- wrapper
def actor_forward(state, params, *, block_b=2048):
    """state: (B, state_dim) -> action: (B, action_dim), tanh-bounded.

    Batch is tiled along a 1-D "parallel" grid; weights/biases stay resident in
    VMEM across all tiles.  No input padding copy: the last tile may be ragged
    (Pallas masks the out-of-bounds writeback; each row is independent).
    """
    B, S = state.shape
    A = params["w34"].shape[1]

    # Sublane-align the requested tile (the (8,128) BlockSpec rule).
    block_b = max(8, -(-int(block_b) // 8) * 8)

    if B > block_b:
        tb = block_b
    else:
        # Prefer >= 2 tiles (each a multiple of 8 rows) so the parallel batch
        # axis can shard across both TensorCores on v7x; harmless on v5e/v6e.
        half = ((B + 1) // 2 + 7) // 8 * 8
        tb = half if (B >= 16 and half < B) else B
    grid = (pl.cdiv(B, tb),)

    resident = lambda shp: pl.BlockSpec(shp, lambda i: (0, 0))

    out = pl.pallas_call(
        actor_kernel,
        out_shape=jax.ShapeDtypeStruct((B, A), jnp.float32),
        grid=grid,
        in_specs=[
            pl.BlockSpec((tb, S), lambda i: (i, 0)),   # batch-tiled input
            resident(params["w1"].shape),
            resident(params["w2"].shape),
            resident(params["w34"].shape),
            resident(params["b"].shape),
        ],
        out_specs=pl.BlockSpec((tb, A), lambda i: (i, 0)),
        compiler_params=pltpu.CompilerParams(
            dimension_semantics=("parallel",)),
    )(state, params["w1"], params["w2"], params["w34"], params["b"])
    return out


# ----------------------------------------------------------------------------- params
def _xavier_uniform(key, fan_in, fan_out):
    bound = math.sqrt(6.0 / (fan_in + fan_out))
    # (in, out) layout == transpose of torch's (out, in); same matmul result.
    return jax.random.uniform(key, (fan_in, fan_out), jnp.float32, -bound, bound)


def _bn_fold(w, b, num_features, eps=1e-5):
    """Fold eval-mode BatchNorm1d (default running stats) into (w, b)."""
    gamma = jnp.ones((num_features,), jnp.float32)
    beta = jnp.zeros((num_features,), jnp.float32)
    running_mean = jnp.zeros((num_features,), jnp.float32)
    running_var = jnp.ones((num_features,), jnp.float32)
    scale = gamma / jnp.sqrt(running_var + eps)
    shift = beta - running_mean * scale
    return w * scale[None, :], b * scale + shift


def init_actor_params(key, state_dim, action_dim, *, sigma_init=0.05,
                      noise_key=None):
    """Builds BN-folded weights, folds layers 3+4, packs biases.  Returns f32 params."""
    assert action_dim <= 128
    k1, k2, k3, k4, k5 = jax.random.split(key, 5)

    # Linear(state_dim,128) + BN(128)
    w1, b1 = _bn_fold(_xavier_uniform(k1, state_dim, 128),
                      jnp.zeros((128,), jnp.float32), 128)
    # Linear(128,128) + BN(128)
    w2, b2 = _bn_fold(_xavier_uniform(k2, 128, 128),
                      jnp.zeros((128,), jnp.float32), 128)
    # Linear(128,64) + BN(64)
    w3, b3 = _bn_fold(_xavier_uniform(k3, 128, 64),
                      jnp.zeros((64,), jnp.float32), 64)

    # NoisyLinear(64, action_dim): uniform(-sqrt(3/64), sqrt(3/64)) init;
    # effective weight/bias = base + sigma * epsilon (epsilon buffers default to 0).
    bound = math.sqrt(3.0 / 64.0)
    wo = jax.random.uniform(k4, (64, action_dim), jnp.float32, -bound, bound)
    bo = jax.random.uniform(k5, (action_dim,), jnp.float32, -bound, bound)
    if noise_key is not None:
        kw, kb = jax.random.split(noise_key)
        wo = wo + sigma_init * jax.random.normal(kw, (64, action_dim), jnp.float32)
        bo = bo + sigma_init * jax.random.normal(kb, (action_dim,), jnp.float32)

    # Algebraic fold of layer 3 (Linear+BN) and the output layer: one 128->A matmul.
    w34 = w3 @ wo
    b34 = b3 @ wo + bo

    # Pack all biases into one (3, 128) array -> a single resident DMA.
    b_pack = jnp.zeros((3, 128), jnp.float32)
    b_pack = (b_pack.at[0, :].set(b1)
                     .at[1, :].set(b2)
                     .at[2, :action_dim].set(b34))

    return {"w1": w1, "w2": w2, "w34": w34, "b": b_pack}


def cast_params(params, dtype):
    """Cast matmul weights once (e.g. to bf16 for v6e/v7x MXU); biases stay f32."""
    out = dict(params)
    for k in ("w1", "w2", "w34"):
        out[k] = params[k].astype(dtype)
    return out


# ----------------------------------------------------------------------------- reference
def actor_ref(state, params):
    """Pure-JAX reference (inference-mode forward) for correctness check (f32 params)."""
    x = state.astype(jnp.float32)
    h = jnp.maximum(x @ params["w1"] + params["b"][0:1, :], 0.0)
    h = jnp.maximum(h @ params["w2"] + params["b"][1:2, :], 0.0)
    a = h @ params["w34"] + params["b"][2:3, :params["w34"].shape[1]]
    return jnp.tanh(a)


# ----------------------------------------------------------------------------- demo
if __name__ == "__main__":
    state_dim, action_dim, batch = 12, 4, 8
    key = jax.random.PRNGKey(0)
    kp, ks, kl = jax.random.split(key, 3)

    params = init_actor_params(kp, state_dim, action_dim)   # f32 master params

    # Small batch, single tile, f32 compute.
    state = jax.random.normal(ks, (batch, state_dim), jnp.float32)
    act = actor_forward(state, params)
    jax.block_until_ready(act)
    assert act.shape == (batch, action_dim), act.shape
    assert jnp.allclose(act, actor_ref(state, params), atol=1e-4, rtol=1e-4)

    # Larger batch: 2-tile grid with a ragged last tile (no jnp.pad copy), f32.
    big_b = 1000
    state_big = jax.random.normal(kl, (big_b, state_dim), jnp.float32)
    act_big = actor_forward(state_big, params, block_b=1024)
    jax.block_until_ready(act_big)
    assert act_big.shape == (big_b, action_dim)
    assert jnp.allclose(act_big, actor_ref(state_big, params),
                        atol=1e-4, rtol=1e-4)

    # bf16 MXU path (f32 accumulation + f32 epilogue); weights cast once, not per call.
    params_bf16 = cast_params(params, jnp.bfloat16)
    act_bf16 = actor_forward(state_big, params_bf16, block_b=1024)
    jax.block_until_ready(act_bf16)
    assert jnp.allclose(act_bf16, actor_ref(state_big, params), atol=3e-2)

    print("KERNEL_OK")
</pallas_src>

<mosaic_0001>
module attributes {stable_mosaic.version = 11 : i64} {
  func.func @actor_kernel(%arg0: i32, %arg1: memref<8x12xf32, #tpu.memory_space<vmem>>, %arg2: memref<12x128xf32, #tpu.memory_space<vmem>>, %arg3: memref<128x128xf32, #tpu.memory_space<vmem>>, %arg4: memref<128x4xf32, #tpu.memory_space<vmem>>, %arg5: memref<3x128xf32, #tpu.memory_space<vmem>>, %arg6: memref<8x4xf32, #tpu.memory_space<vmem>>) attributes {dimension_semantics = [#tpu.dimension_semantics<parallel>], iteration_bounds = array<i64: 1>, scalar_prefetch = 0 : i64, scratch_operands = 0 : i64, tpu.core_type = #tpu.core_type<tc>, window_params = [{transform_indices = @transform_0, window_bounds = array<i64: 8, 12>}, {pipeline_mode = #tpu.pipeline_mode<synchronous>, transform_indices = @transform_1, window_bounds = array<i64: 12, 128>}, {pipeline_mode = #tpu.pipeline_mode<synchronous>, transform_indices = @transform_2, window_bounds = array<i64: 128, 128>}, {pipeline_mode = #tpu.pipeline_mode<synchronous>, transform_indices = @transform_3, window_bounds = array<i64: 128, 4>}, {pipeline_mode = #tpu.pipeline_mode<synchronous>, transform_indices = @transform_4, window_bounds = array<i64: 3, 128>}, {transform_indices = @transform_5, window_bounds = array<i64: 8, 4>}]} {
    %c0 = arith.constant 0 : index
    %c0_0 = arith.constant 0 : index
    %0 = vector.load %arg1[%c0, %c0_0] : memref<8x12xf32, #tpu.memory_space<vmem>>, vector<8x12xf32>
    %c0_1 = arith.constant 0 : index
    %c0_2 = arith.constant 0 : index
    %1 = vector.load %arg2[%c0_1, %c0_2] : memref<12x128xf32, #tpu.memory_space<vmem>>, vector<12x128xf32>
    %cst = arith.constant dense<0.000000e+00> : vector<8x128xf32>
    %2 = tpu.matmul %0, %1, %cst {dimension_numbers = #tpu.dot_dimension_numbers<[1], [0], [0], [1], [0, 0, 1, 1], [], []>} : vector<8x12xf32>, vector<12x128xf32>, vector<8x128xf32> -> vector<8x128xf32>
    %c0_3 = arith.constant 0 : index
    %c0_4 = arith.constant 0 : index
    %3 = vector.load %arg5[%c0_3, %c0_4] : memref<3x128xf32, #tpu.memory_space<vmem>>, vector<1x128xf32>
    %4 = vector.broadcast %3 : vector<1x128xf32> to vector<8x128xf32>
    %5 = arith.addf %2, %4 : vector<8x128xf32>
    %cst_5 = arith.constant 0.000000e+00 : f32
    %6 = vector.broadcast %cst_5 : f32 to vector<8x128xf32>
    %7 = arith.maximumf %5, %6 : vector<8x128xf32>
    %c0_6 = arith.constant 0 : index
    %c0_7 = arith.constant 0 : index
    %8 = vector.load %arg3[%c0_6, %c0_7] : memref<128x128xf32, #tpu.memory_space<vmem>>, vector<128x128xf32>
    %cst_8 = arith.constant dense<0.000000e+00> : vector<8x128xf32>
    %9 = tpu.matmul %7, %8, %cst_8 {dimension_numbers = #tpu.dot_dimension_numbers<[1], [0], [0], [1], [0, 0, 1, 1], [], []>} : vector<8x128xf32>, vector<128x128xf32>, vector<8x128xf32> -> vector<8x128xf32>
    %c1 = arith.constant 1 : index
    %c0_9 = arith.constant 0 : index
    %10 = vector.load %arg5[%c1, %c0_9] : memref<3x128xf32, #tpu.memory_space<vmem>>, vector<1x128xf32>
    %11 = vector.broadcast %10 : vector<1x128xf32> to vector<8x128xf32>
    %12 = arith.addf %9, %11 : vector<8x128xf32>
    %cst_10 = arith.constant 0.000000e+00 : f32
    %13 = vector.broadcast %cst_10 : f32 to vector<8x128xf32>
    %14 = arith.maximumf %12, %13 : vector<8x128xf32>
    %c0_11 = arith.constant 0 : index
    %c0_12 = arith.constant 0 : index
    %15 = vector.load %arg4[%c0_11, %c0_12] : memref<128x4xf32, #tpu.memory_space<vmem>>, vector<128x4xf32>
    %cst_13 = arith.constant dense<0.000000e+00> : vector<8x4xf32>
    %16 = tpu.matmul %14, %15, %cst_13 {dimension_numbers = #tpu.dot_dimension_numbers<[1], [0], [0], [1], [0, 0, 1, 1], [], []>} : vector<8x128xf32>, vector<128x4xf32>, vector<8x4xf32> -> vector<8x4xf32>
    %c2 = arith.constant 2 : index
    %c0_14 = arith.constant 0 : index
    %17 = vector.load %arg5[%c2, %c0_14] : memref<3x128xf32, #tpu.memory_space<vmem>>, vector<1x4xf32>
    %18 = vector.broadcast %17 : vector<1x4xf32> to vector<8x4xf32>
    %19 = arith.addf %16, %18 : vector<8x4xf32>
    %20 = math.tanh %19 : vector<8x4xf32>
    %c0_15 = arith.constant 0 : index
    %c0_16 = arith.constant 0 : index
    %21 = vector.load %arg6[%c0_15, %c0_16] : memref<8x4xf32, #tpu.memory_space<vmem>>, vector<8x4xf32>
    tpu.vector_store %arg6[%c0_15, %c0_16], %20 {strides = array<i32>} : memref<8x4xf32, #tpu.memory_space<vmem>>, vector<8x4xf32>,
    return
  }
  func.func @transform_0(%arg0: i32) -> (i32, i32) {
    %c0_i32 = arith.constant 0 : i32
    %c0_i32_0 = arith.constant 0 : i32
    return %arg0, %c0_i32 : i32, i32
  }
  func.func @transform_1(%arg0: i32) -> (i32, i32) {
    %c0_i32 = arith.constant 0 : i32
    %c0_i32_0 = arith.constant 0 : i32
    %c0_i32_1 = arith.constant 0 : i32
    return %c0_i32, %c0_i32_0 : i32, i32
  }
  func.func @transform_2(%arg0: i32) -> (i32, i32) {
    %c0_i32 = arith.constant 0 : i32
    %c0_i32_0 = arith.constant 0 : i32
    %c0_i32_1 = arith.constant 0 : i32
    return %c0_i32, %c0_i32_0 : i32, i32
  }
  func.func @transform_3(%arg0: i32) -> (i32, i32) {
    %c0_i32 = arith.constant 0 : i32
    %c0_i32_0 = arith.constant 0 : i32
    %c0_i32_1 = arith.constant 0 : i32
    return %c0_i32, %c0_i32_0 : i32, i32
  }
  func.func @transform_4(%arg0: i32) -> (i32, i32) {
    %c0_i32 = arith.constant 0 : i32
    %c0_i32_0 = arith.constant 0 : i32
    %c0_i32_1 = arith.constant 0 : i32
    return %c0_i32, %c0_i32_0 : i32, i32
  }
  func.func @transform_5(%arg0: i32) -> (i32, i32) {
    %c0_i32 = arith.constant 0 : i32
    %c0_i32_0 = arith.constant 0 : i32
    return %arg0, %c0_i32 : i32, i32
  }
}

</mosaic_0001>

<bundles_post_ra>
// kernel: tpu_custom_call.1
= control target key start
LH: loop header
LB: loop body
LE: loop exit
PB: predicated region body
PF: predicated region fallthrough
CT: control target
= control target key end

     0   :  { %10 = vsyncpa [#allocation3], 0  ;;  %s686_s0 = inlined_call_operand.hbm [shape: f32[8,12], index: 0, kind: input, shape index: {}]   ;;  %s687_s1 = inlined_call_operand.hbm [shape: f32[12,128], index: 1, kind: input, shape index: {}]   ;;  %s688_s2 = inlined_call_operand.vmem [shape: f32[128,128], index: 2, kind: input, shape index: {}]   ;;  %s689_s3 = inlined_call_operand.vmem [shape: f32[128,4], index: 3, kind: input, shape index: {}]   ;;  %s690_s4 = inlined_call_operand.vmem [shape: f32[3,128], index: 4, kind: input, shape index: {}]   ;;  %s691_s5 = inlined_call_operand.vmem [shape: f32[8,4], index: 5, kind: output, shape index: {}]  }
   0x1   :  { %11 = vsyncpa [#allocation5], 0  ;;  %s496_s18 = smov [#allocation2]   ;;  %s497_s20 = smov [#allocation4]  }
   0x2   :  { %s18_s19 = sshll.u32 %s496_s18, 4  ;;  %s27_s21 = sshll.u32 %s497_s20, 4  ;;  %s19_s19 = int_to_ptr.vmem [resolvable:$true] %s18_s19  ;;  %s28_s21 = int_to_ptr.vmem [resolvable:$true] %s27_s21 }
   0x3   :  { %s460_s22 = scalar_lea.vmem %s19_s19, 128  ;;  %p465_p1 = scmp.lt.s32.totalorder %s19_s19, %s19_s19 }
   0x4   :  { %p461_p0 = scmp.ne.s32.totalorder %s19_s19, %s460_s22  ;;  %p466_p2 = scmp.lt.s32.totalorder %s460_s22, %s460_s22 }
   0x6   :  { %p467_p3 = por %p466_p2, %p465_p1 }
   0x8   :  { %p468_p4 = pnand %p467_p3, %p461_p0 }
   0xa   :  { %471 = shalt.err (!%p468_p4)
}
   0xb   :  { %21 = dma.hbm_to_vmem [thread:$0]  %s686_s0, 128, %s19_s19, [#allocation3]  }
   0xc   :  { %s480_s25 = scalar_lea.vmem %s28_s21, 256  ;;  %p485_p6 = scmp.lt.s32.totalorder %s28_s21, %s28_s21 }
   0xd   :  { %p481_p5 = scmp.ne.s32.totalorder %s28_s21, %s480_s25  ;;  %p486_p7 = scmp.lt.s32.totalorder %s480_s25, %s480_s25 }
   0xf   :  { %p487_p8 = por %p486_p7, %p485_p6 }
  0x11   :  { %p488_p9 = pnand %p487_p8, %p481_p5 }
  0x13   :  { %491 = shalt.err (!%p488_p9)
}
  0x14   :  { %s498_s26 = smov 128   ;;  %s499_s27 = smov 8  }
  0x15   :  { %33 = dma.hbm_to_vmem [thread:$0]  %s687_s1, 256, %s28_s21, [#allocation5], %s498_s26, %s498_s26, %s499_s27  }
  0x16   :  { %492 = dma.done.wait [#allocation3], 128  }
  0x17   :  { %493 = vsyncadd [#allocation3], 4294967168 }
  0x18   :  { %494 = dma.done.wait [#allocation5], 256  }
  0x19   :  { %495 = vsyncadd [#allocation5], 4294967040  ;;  %v500_v0 = vmov 0.0   ;;  %vm501_vm0 = vmmov 0   ;;  %vm58_vm1 = vcmask 1043456   ;;  %v47_v2 = vld [vmem:[#allocation4] sm:$0xff] }
  0x1a   :  { %367 = vmatprep.subr.mxu0 %v500_v0  ;;  %371 = vmatprep.mubr.msk.f32.mxu0 %vm501_vm0, %v500_v0  ;;  %v48_v1 = vld [vmem:[#allocation4 + $0x8] sm:$0xf]  ;;  %v46_v3 = vld [vmem:[#allocation2] sm:$0xff]  ;;  %vm54_vm2 = vcmask 97280   ;;  %v148_v4 = vld [vmem:[%s688_s2 + $0x78] sm:$0xff]  ;;  %vm317_vm3 = vcmask 31744  }
  0x1b   :  { %374 = vmatprep.subr.mxu1 %v500_v0  ;;  %406 = vmatprep.mubr.msk.f32.mxu1 %vm501_vm0, %v500_v0  ;;  %v147_v5 = vld [vmem:[%s688_s2 + $0x70] sm:$0xff]  ;;  %v146_v6 = vld [vmem:[%s688_s2 + $0x68] sm:$0xff]  ;;  %v145_v7 = vld [vmem:[%s688_s2 + $0x60] sm:$0xff] }
  0x1c   :  { %368 = vmatpush3.msk.msra.mxu0 %vm58_vm1, %v48_v1  ;;  %375 = vmatpush3.msra.mxu1 %v148_v4  ;;  %v144_v8 = vld [vmem:[%s688_s2 + $0x58] sm:$0xff]  ;;  %v143_v9 = vld [vmem:[%s688_s2 + $0x50] sm:$0xff]  ;;  %v142_v10 = vld [vmem:[%s688_s2 + $0x48] sm:$0xff] }
  0x1d   :  { %369 = vmatprep.subr.mxu0 %v500_v0  ;;  %376 = vmatprep.subr.mxu1 %v500_v0  ;;  %v141_v11 = vld [vmem:[%s688_s2 + $0x40] sm:$0xff]  ;;  %v140_v12 = vld [vmem:[%s688_s2 + $0x38] sm:$0xff]  ;;  %v139_v13 = vld [vmem:[%s688_s2 + $0x30] sm:$0xff] }
  0x1e   :  { %370 = vmatpush3.msra.mxu0 %v47_v2  ;;  %377 = vmatpush3.msra.mxu1 %v147_v5  ;;  %v138_v14 = vld [vmem:[%s688_s2 + $0x28] sm:$0xff]  ;;  %v137_v15 = vld [vmem:[%s688_s2 + $0x20] sm:$0xff]  ;;  %v136_v16 = vld [vmem:[%s688_s2 + $0x18] sm:$0xff] }
  0x1f   :  { %372 = vmatmul.mubr.msk.f32.vlgmr.msra.gmra.mxu0 %vm54_vm2, %v46_v3  ;;  %378 = vmatprep.subr.mxu1 %v500_v0  ;;  %v135_v17 = vld [vmem:[%s688_s2 + $0x10] sm:$0xff]  ;;  %v134_v18 = vld [vmem:[%s688_s2 + $0x8] sm:$0xff]  ;;  %v133_v19 = vld [vmem:[%s688_s2] sm:$0xff] }
  0x20   :  { %409 = vmatprep.subr.mxu0 %v500_v0  ;;  %379 = vmatpush3.msra.mxu1 %v146_v6  ;;  %v240_v20 = vld [vmem:[%s689_s3 + $0x78] sm:$0xff]  ;;  %v239_v21 = vld [vmem:[%s689_s3 + $0x70] sm:$0xff]  ;;  %v238_v22 = vld [vmem:[%s689_s3 + $0x68] sm:$0xff] }
  0x21   :  { %441 = vmatprep.mubr.msk.f32.mxu0 %vm501_vm0, %v500_v0  ;;  %380 = vmatprep.subr.mxu1 %v500_v0  ;;  %v237_v23 = vld [vmem:[%s689_s3 + $0x60] sm:$0xff]  ;;  %v236_v24 = vld [vmem:[%s689_s3 + $0x58] sm:$0xff]  ;;  %v235_v25 = vld [vmem:[%s689_s3 + $0x50] sm:$0xff] }
  0x22   :  { %381 = vmatpush3.msra.mxu1 %v145_v7  ;;  %410 = vmatpush3.msra.mxu0 %v240_v20  ;;  %v234_v26 = vld [vmem:[%s689_s3 + $0x48] sm:$0xff]  ;;  %v233_v27 = vld [vmem:[%s689_s3 + $0x40] sm:$0xff]  ;;  %v232_v28 = vld [vmem:[%s689_s3 + $0x38] sm:$0xff] }
  0x23   :  { %382 = vmatprep.subr.mxu1 %v500_v0  ;;  %411 = vmatprep.subr.mxu0 %v500_v0  ;;  %v231_v29 = vld [vmem:[%s689_s3 + $0x30] sm:$0xff]  ;;  %v230_v30 = vld [vmem:[%s689_s3 + $0x28] sm:$0xff]  ;;  %v229_v31 = vld [vmem:[%s689_s3 + $0x20] sm:$0xff] }
  0x24   :  { %383 = vmatpush3.msra.mxu1 %v144_v8  ;;  %412 = vmatpush3.msra.mxu0 %v239_v21  ;;  %v228_v32 = vld [vmem:[%s689_s3 + $0x18] sm:$0xff]  ;;  %v325_v33 = vld [vmem:[%s690_s4] ss:$0 sm:$0xff]  ;;  %v227_v38 = vld [vmem:[%s689_s3 + $0x10] sm:$0xff] }
  0x25   :  { %384 = vmatprep.subr.mxu1 %v500_v0  ;;  %413 = vmatprep.subr.mxu0 %v500_v0  ;;  %v226_v39 = vld [vmem:[%s689_s3 + $0x8] sm:$0xff]  ;;  %v225_v40 = vld [vmem:[%s689_s3] sm:$0xff] }
  0x26   :  { %385 = vmatpush3.msra.mxu1 %v143_v9  ;;  %414 = vmatpush3.msra.mxu0 %v238_v22  ;;  %v328_v41 = vld [vmem:[%s690_s4 + $0x1] ss:$0 sm:$0xff]  ;;  %v329_v46 = vld [vmem:[%s690_s4 + $0x2] ss:$0 sm:$0xff] }
  0x27   :  { %386 = vmatprep.subr.mxu1 %v500_v0  ;;  %415 = vmatprep.subr.mxu0 %v500_v0 }
  0x28   :  { %387 = vmatpush3.msra.mxu1 %v142_v10  ;;  %416 = vmatpush3.msra.mxu0 %v237_v23 }
  0x29   :  { %388 = vmatprep.subr.mxu1 %v500_v0  ;;  %417 = vmatprep.subr.mxu0 %v500_v0 }
  0x2a   :  { %389 = vmatpush3.msra.mxu1 %v141_v11  ;;  %418 = vmatpush3.msra.mxu0 %v236_v24 }
  0x2b   :  { %390 = vmatprep.subr.mxu1 %v500_v0  ;;  %419 = vmatprep.subr.mxu0 %v500_v0 }
  0x2c   :  { %391 = vmatpush3.msra.mxu1 %v140_v12  ;;  %420 = vmatpush3.msra.mxu0 %v235_v25 }
  0x2d   :  { %392 = vmatprep.subr.mxu1 %v500_v0  ;;  %421 = vmatprep.subr.mxu0 %v500_v0 }
  0x2e   :  { %393 = vmatpush3.msra.mxu1 %v139_v13  ;;  %422 = vmatpush3.msra.mxu0 %v234_v26 }
  0x2f   :  { %394 = vmatprep.subr.mxu1 %v500_v0  ;;  %423 = vmatprep.subr.mxu0 %v500_v0 }
  0x30   :  { %395 = vmatpush3.msra.mxu1 %v138_v14  ;;  %424 = vmatpush3.msra.mxu0 %v233_v27 }
  0x31   :  { %396 = vmatprep.subr.mxu1 %v500_v0  ;;  %425 = vmatprep.subr.mxu0 %v500_v0 }
  0x32   :  { %397 = vmatpush3.msra.mxu1 %v137_v15  ;;  %426 = vmatpush3.msra.mxu0 %v232_v28 }
  0x33   :  { %398 = vmatprep.subr.mxu1 %v500_v0  ;;  %427 = vmatprep.subr.mxu0 %v500_v0 }
  0x34   :  { %399 = vmatpush3.msra.mxu1 %v136_v16  ;;  %428 = vmatpush3.msra.mxu0 %v231_v29 }
  0x35   :  { %400 = vmatprep.subr.mxu1 %v500_v0  ;;  %429 = vmatprep.subr.mxu0 %v500_v0 }
  0x36   :  { %401 = vmatpush3.msra.mxu1 %v135_v17  ;;  %430 = vmatpush3.msra.mxu0 %v230_v30 }
  0x37   :  { %402 = vmatprep.subr.mxu1 %v500_v0  ;;  %431 = vmatprep.subr.mxu0 %v500_v0 }
  0x38   :  { %403 = vmatpush3.msra.mxu1 %v134_v18  ;;  %432 = vmatpush3.msra.mxu0 %v229_v31 }
  0x39   :  { %404 = vmatprep.subr.mxu1 %v500_v0  ;;  %433 = vmatprep.subr.mxu0 %v500_v0 }
  0x3a   :  { %405 = vmatpush3.msra.mxu1 %v133_v19  ;;  %434 = vmatpush3.msra.mxu0 %v228_v32 }
  0x3b   :  { %435 = vmatprep.subr.mxu0 %v500_v0 }
  0x3c   :  { %436 = vmatpush3.msra.mxu0 %v227_v38 }
  0x3d   :  { %437 = vmatprep.subr.mxu0 %v500_v0 }
  0x3e   :  { %438 = vmatpush3.msra.mxu0 %v226_v39 }
  0x3f   :  { %439 = vmatprep.subr.mxu0 %v500_v0 }
  0x40   :  { %440 = vmatpush3.msra.mxu0 %v225_v40 }
  0xdf   :  { %v128_v34 = vpop.f32.mrf.mxu0 }
  0xe0   :  { %v129_v35 = vadd.f32 %v325_v33, %v128_v34 }
  0xe1   :  { %v373_v36 = vpop.f32.mrf.mxu0 }
  0xe2   :  { %v132_v37 = vmax.f32 %v129_v35, 0.0 }
  0xe4   :  { %407 = vmatmul.mubr.f32.vlgmr.msra.gmra.mxu1 %v132_v37 }
 0x1a4   :  { %v220_v42 = vpop.f32.mrf.mxu1 }
 0x1a5   :  { %v221_v43 = vadd.f32 %v328_v41, %v220_v42 }
 0x1a6   :  { %v408_v44 = vpop.f32.mrf.mxu1 }
 0x1a7   :  { %v224_v45 = vmax.f32 %v221_v43, 0.0 }
 0x1a9   :  { %442 = vmatmul.mubr.f32.vlgmr.msra.gmra.mxu0 %v224_v45 }
 0x269   :  { %v312_v47 = vpop.f32.mrf.mxu0 }
 0x26a   :  { %v313_v48 = vadd.f32 %v329_v46, %v312_v47 }
 0x26b   :  { %v443_v49 = vpop.f32.mrf.mxu0 }
 0x26c   :  { %450 = vtanh.f32 %v313_v48 }
 0x279   :  { %v451_v50 = vpop.eup %450 }
 0x27a   :  { %318 = vst.msk [vmem:[%s691_s5] sm:$0xff] %vm317_vm3, %v451_v50 }
 0x27b   :  { %323 = vsyncpa [#allocation3], 1 }
 0x27c   :  { %324 = vsyncpa [#allocation5], 1 }

</bundles_post_ra>
